<compile_context>
chip_gen: v6e
topology: v6e:2x2x1
jax: 0.10.0
libtpu: 0.0.40
codegen_flags: <defaults>
</compile_context>

<pallas_src>
import jax
import jax.numpy as jnp
from jax.experimental import pallas as pl
from jax.experimental.pallas import tpu as pltpu


def _outconv_kernel(x_ref, w_ref, b_ref, o_ref):
    # x_ref: (Cin, tl)   w_ref: (Cout, Cin)   b_ref: (Cout, 1)   o_ref: (Cout, tl)
    acc = jnp.dot(w_ref[...], x_ref[...], preferred_element_type=jnp.float32)
    o_ref[...] = (acc + b_ref[...]).astype(o_ref.dtype)


def outconv(x, weight, bias, *, tl=1024):
    """1x1 Conv2d forward, identical semantics to nn.Conv2d(Cin, Cout, kernel_size=1).

    x:      (N, Cin, H, W)    float32 (NCHW, like PyTorch)
    weight: (Cout, Cin, 1, 1) float32 (PyTorch conv weight layout)
    bias:   (Cout,)           float32
    returns (N, Cout, H, W)
    """
    N, Cin, H, W = x.shape
    Cout = weight.shape[0]
    HW = H * W

    # Spatial tile on the lane axis: multiple of 128, no larger than needed,
    # large enough (default 1024) to amortize the ~0.35us per-grid-step cost.
    tl = max(128, min(tl, pl.cdiv(HW, 128) * 128))
    HW_pad = pl.cdiv(HW, tl) * tl

    x3 = x.reshape(N, Cin, HW)                      # pure reshape, no transpose
    if HW_pad != HW:
        x3 = jnp.pad(x3, ((0, 0), (0, 0), (0, HW_pad - HW)))

    w2 = weight.reshape(Cout, Cin)                  # (Cout, Cin), resident
    b2 = bias.reshape(Cout, 1)                      # (Cout, 1),   resident

    grid = (N, HW_pad // tl)                        # both axes fully parallel

    cost = pl.CostEstimate(
        flops=2 * N * HW_pad * Cin * Cout,
        transcendentals=0,
        bytes_accessed=4 * (N * HW_pad * Cin + Cin * Cout + Cout
                            + N * HW_pad * Cout),
    )

    out3 = pl.pallas_call(
        _outconv_kernel,
        out_shape=jax.ShapeDtypeStruct((N, Cout, HW_pad), x.dtype),
        grid_spec=pltpu.PrefetchScalarGridSpec(
            num_scalar_prefetch=0,
            grid=grid,
            in_specs=[
                # batch dim squeezed; Cin (small) on sublane, spatial on lanes.
                pl.BlockSpec((None, Cin, tl), lambda n, s: (n, 0, s)),
                # weight / bias: constant block index -> stay resident in VMEM.
                pl.BlockSpec((Cout, Cin), lambda n, s: (0, 0)),
                pl.BlockSpec((Cout, 1), lambda n, s: (0, 0)),
            ],
            # lane-dense output: last dim = tl (multiple of 128) -> unmasked vst.
            out_specs=pl.BlockSpec((None, Cout, tl), lambda n, s: (n, 0, s)),
        ),
        compiler_params=pltpu.CompilerParams(
            dimension_semantics=("parallel", "parallel")),
        cost_estimate=cost,
    )(x3, w2, b2)

    if HW_pad != HW:
        out3 = out3[:, :, :HW]
    return out3.reshape(N, Cout, H, W)


if __name__ == "__main__":
    key = jax.random.PRNGKey(0)
    kx, kw, kb = jax.random.split(key, 3)

    N, Cin, Cout, H, W = 2, 4, 3, 16, 16

    x = jax.random.normal(kx, (N, Cin, H, W), dtype=jnp.float32)
    # Deterministic synthetic params (nn.Conv2d(in, out, kernel_size=1) shapes).
    weight = jax.random.normal(kw, (Cout, Cin, 1, 1), dtype=jnp.float32) * 0.1
    bias = jax.random.normal(kb, (Cout,), dtype=jnp.float32) * 0.1

    y = outconv(x, weight, bias)
    y = jax.block_until_ready(y)

    # Reference check against plain-JAX 1x1 conv semantics.
    ref = jnp.einsum("nchw,oc->nohw", x, weight.reshape(Cout, Cin)) \
        + bias.reshape(1, Cout, 1, 1)
    assert y.shape == (N, Cout, H, W)
    assert jnp.allclose(y, ref, atol=1e-5, rtol=1e-5)

    print("KERNEL_OK")
</pallas_src>

<mosaic_0001>
module attributes {stable_mosaic.version = 11 : i64} {
  func.func @_outconv_kernel(%arg0: i32, %arg1: i32, %arg2: memref<1x4x256xf32, #tpu.memory_space<vmem>>, %arg3: memref<3x4xf32, #tpu.memory_space<vmem>>, %arg4: memref<3x1xf32, #tpu.memory_space<vmem>>, %arg5: memref<1x3x256xf32, #tpu.memory_space<vmem>>) attributes {dimension_semantics = [#tpu.dimension_semantics<parallel>, #tpu.dimension_semantics<parallel>], iteration_bounds = array<i64: 2, 1>, scalar_prefetch = 0 : i64, scratch_operands = 0 : i64, tpu.core_type = #tpu.core_type<tc>, window_params = [{transform_indices = @transform_0, window_bounds = array<i64: 1, 4, 256>}, {pipeline_mode = #tpu.pipeline_mode<synchronous>, transform_indices = @transform_1, window_bounds = array<i64: 3, 4>}, {pipeline_mode = #tpu.pipeline_mode<synchronous>, transform_indices = @transform_2, window_bounds = array<i64: 3, 1>}, {transform_indices = @transform_3, window_bounds = array<i64: 1, 3, 256>}]} {
    %c0 = arith.constant 0 : index
    %c0_0 = arith.constant 0 : index
    %0 = vector.load %arg3[%c0, %c0_0] : memref<3x4xf32, #tpu.memory_space<vmem>>, vector<3x4xf32>
    %c0_1 = arith.constant 0 : index
    %c0_2 = arith.constant 0 : index
    %c0_3 = arith.constant 0 : index
    %1 = vector.load %arg2[%c0_1, %c0_2, %c0_3] : memref<1x4x256xf32, #tpu.memory_space<vmem>>, vector<1x4x256xf32>
    %2 = vector.shape_cast %1 : vector<1x4x256xf32> to vector<4x256xf32>
    %cst = arith.constant dense<0.000000e+00> : vector<3x256xf32>
    %3 = tpu.matmul %0, %2, %cst {dimension_numbers = #tpu.dot_dimension_numbers<[1], [0], [0], [1], [0, 0, 1, 1], [], []>} : vector<3x4xf32>, vector<4x256xf32>, vector<3x256xf32> -> vector<3x256xf32>
    %c0_4 = arith.constant 0 : index
    %c0_5 = arith.constant 0 : index
    %4 = vector.load %arg4[%c0_4, %c0_5] : memref<3x1xf32, #tpu.memory_space<vmem>>, vector<3x1xf32>
    %5 = vector.broadcast %4 : vector<3x1xf32> to vector<3x256xf32>
    %6 = arith.addf %3, %5 : vector<3x256xf32>
    %c0_6 = arith.constant 0 : index
    %c0_7 = arith.constant 0 : index
    %c0_8 = arith.constant 0 : index
    %7 = vector.load %arg5[%c0_6, %c0_7, %c0_8] : memref<1x3x256xf32, #tpu.memory_space<vmem>>, vector<1x3x256xf32>
    %8 = vector.shape_cast %7 : vector<1x3x256xf32> to vector<3x256xf32>
    %9 = vector.shape_cast %6 : vector<3x256xf32> to vector<1x3x256xf32>
    tpu.vector_store %arg5[%c0_6, %c0_7, %c0_8], %9 {strides = array<i32>} : memref<1x3x256xf32, #tpu.memory_space<vmem>>, vector<1x3x256xf32>,
    return
  }
  func.func @transform_0(%arg0: i32, %arg1: i32) -> (i32, i32, i32) {
    %c0_i32 = arith.constant 0 : i32
    %c0_i32_0 = arith.constant 0 : i32
    return %arg0, %c0_i32, %arg1 : i32, i32, i32
  }
  func.func @transform_1(%arg0: i32, %arg1: i32) -> (i32, i32) {
    %c0_i32 = arith.constant 0 : i32
    %c0_i32_0 = arith.constant 0 : i32
    %c0_i32_1 = arith.constant 0 : i32
    return %c0_i32, %c0_i32_0 : i32, i32
  }
  func.func @transform_2(%arg0: i32, %arg1: i32) -> (i32, i32) {
    %c0_i32 = arith.constant 0 : i32
    %c0_i32_0 = arith.constant 0 : i32
    %c0_i32_1 = arith.constant 0 : i32
    return %c0_i32, %c0_i32_0 : i32, i32
  }
  func.func @transform_3(%arg0: i32, %arg1: i32) -> (i32, i32, i32) {
    %c0_i32 = arith.constant 0 : i32
    %c0_i32_0 = arith.constant 0 : i32
    return %arg0, %c0_i32, %arg1 : i32, i32, i32
  }
}

</mosaic_0001>

<bundles_post_ra>
// kernel: tpu_custom_call.1
= control target key start
LH: loop header
LB: loop body
LE: loop exit
PB: predicated region body
PF: predicated region fallthrough
CT: control target
= control target key end

     0   :  { %8 = vsyncpa [#allocation3], 0  ;;  %s693_s0 = inlined_call_operand.hbm [shape: f32[2,4,256], index: 0, kind: input, shape index: {}]   ;;  %s694_s1 = inlined_call_operand.vmem [shape: f32[3,4], index: 1, kind: input, shape index: {}]   ;;  %s695_s2 = inlined_call_operand.vmem [shape: f32[3,1], index: 2, kind: input, shape index: {}]   ;;  %s696_s3 = inlined_call_operand.vmem [shape: f32[2,3,256], index: 3, kind: output, shape index: {}]  }
   0x1   :  { %10 = vsyncpa [#allocation3 + $0x1], 0  ;;  %s587_s12 = smov 0   ;;  %s589_s13 = smov 0  }
   0x2   :  { %s591_s14 = smov 0   ;;  %s593_s15 = smov 0  }
   0x3   :  { %s595_s16 = smov 0   ;;  %s597_s17 = smov 0  }
   0x4 LB: > { %s407_s18 = sadd.s32 4294967295, %s562_s17   ;;  %s28_s19 = sadd.s32 1, %s558_s16  ;;  %s562_s17 = sphi %s597_s17, %s16_s17   ;;  %s558_s16 = sphi %s595_s16, %s704_s16   ;;  %s554_s15 = sphi %s593_s15, %s703_s15   ;;  %s550_s14 = sphi %s591_s14, %s702_s14   ;;  %s546_s13 = sphi %s589_s13, %s701_s13   ;;  %s542_s12 = sphi %s587_s12, %s700_s12  }
   0x5   : > { %p30_p0 = scmp.ge.s32.totalorder %s28_s19, 2  ;;  %s37_s20 = sadd.s32 1, %s550_s14 }
   0x6   : > { %p44_p1 = scmp.ne.s32.totalorder %s550_s14, %s546_s13  ;;  %p45_p2 = scmp.eq.s32.totalorder %s562_s17, 0 }
   0x7   : > { %s706_s19 = smov (%p30_p0, %s28_s19), 0  ;;  %p50_p4 = scmp.ne.s32.totalorder %s546_s13, %s542_s12 }
   0x8   : > { %p623_p3 = por %p45_p2, %p44_p1  ;;  %s32_s22 = ssub.s32 %s558_s16, %s706_s19 }
   0x9   : > { %p51_p5 = scmp.eq.s32.totalorder %s407_s18, 0  ;;  %p35_p6 = scmp.eq.s32.totalorder %s32_s22, 0 }
   0xa   : > { %p431_p8 = scmp.lt.s32.totalorder %s562_s17, 2  ;;  %s150_s25 = sand.u32 1, %s550_s14  }
   0xb   : > { %p630_p7 = por %p51_p5, %p50_p4  ;;  %s423_s26 = sshll.u32 %s558_s16, 7 }
   0xc   : > { %s636_s24 = scalar_select %p35_p6, %s550_s14, %s37_s20  }
   0xd   : > { %s411_s27 = sshll.u32 %s150_s25, 3  ;;  %s162_s30 = scalar_lea.hbm %s693_s0, %s423_s26 }
   0xe   : > { %s154_s4 = scalar_lea.vmem [#allocation2], %s411_s27  ;;  %p645_p9 = pnand %p431_p8, %p623_p3 }
   0xf   : > { %s164_s5 = sshll.u32 %s154_s4, 4  ;;  %p414_p10 = scmp.ge.s32.totalorder %s562_s17, 1  ;;  %s165_s5 = int_to_ptr.vmem [resolvable:$true] %s164_s5 }
  0x10   : > { %p169_p11 = scmp.lt.s32.totalorder %s562_s17, 3  ;;  %s151_s7 = scalar_lea.sflag [#allocation3], %s150_s25 }
  0x11   : > { %p486_p12 = pneg %p645_p9  ;;  %s497_s8 = scalar_lea.vmem %s165_s5, 128 }
  0x12   : > { %p498_p13 = scmp.ne.s32.totalorder %s165_s5, %s497_s8  ;;  %s564_s9 = smov [#allocation2]  }
  0x13   : > { %s502_s10 = sshll.u32 %s564_s9, 4  ;;  %s503_s10 = int_to_ptr.vmem [resolvable:$false] %s502_s10 }
  0x14   : > { %p500_p0 = pnand %p498_p13, %p486_p12  ;;  %s504_s11 = scalar_lea.vmem %s503_s10, 256 }
  0x15   : > { %p505_p2 = scmp.lt.s32.totalorder %s165_s5, %s503_s10  ;;  %p506_p3 = scmp.lt.s32.totalorder %s504_s11, %s497_s8 }
  0x16   : > { %p501_p1 = pneg %p500_p0 }
  0x17   : > { %p507_p4 = por %p506_p3, %p505_p2 }
  0x19   : > { %p508_p5 = pnand %p507_p4, %p501_p1 }
  0x1b   : > { %511 = shalt.err (!%p508_p5)
}
  0x1c   : > { %430 = dma.hbm_to_vmem [thread:$0]  (!%p645_p9), %s162_s30, 128, %s165_s5, %s151_s7  }
  0x1d   : > { %p170_p6 = pnand %p414_p10, %p169_p11 }
  0x1e   : > { %s175_s12 = sand.u32 (!%p170_p6), 1, %s546_s13  }
  0x1f   : > { %173 = sbr.rel (%p170_p6) target bundleno = 242 (0xf2), region = 32  ;;  %s415_s18 = sshll.u32 (!%p170_p6), %s175_s12, 3 }
  0x20   : > { %s176_s20 = scalar_lea.sflag (!%p170_p6), [#allocation3], %s175_s12  ;;  %s179_s21 = scalar_lea.vmem (!%p170_p6), [#allocation2], %s415_s18 }
  0x24   : > { %537 = dma.done.wait (%p630_p7), %s176_s20, 128  }
  0x25   : > { %539 = vsyncadd (%p630_p7), %s176_s20, 4294967168  ;;  %v565_v0 = vmov 0.0   ;;  %v566_v1 = vmov 0   ;;  %v218_v2 = vld [vmem:[%s179_s21] sm:$0xff]  ;;  %vm231_vm0 = vcmask 1043456   ;;  %vm227_vm1 = vcmask 31744  }
  0x26   : > { %300 = vmatprep.mubr.f32.mxu0 %v565_v0  ;;  %482 = vset.pattern.permute.xlu0 %v566_v1  ;;  %v219_v3 = vld [vmem:[%s695_s2] sm:$0x7]  ;;  %v226_v4 = vcombine.high %v218_v2, %v218_v2  ;;  %p208_p7 = scmp.lt.s32.totalorder %s554_s15, 1 }
  0x27   : > { %222 = vperm.xlu0 %482, %v219_v3   ;;  %v217_v5 = vld [vmem:[%s694_s1] sm:$0x7] }
  0x28   : > { %418 = vmatprep.subr.msk.mxu0 %vm231_vm0, %v226_v4  ;;  %s708_s15 = smov (!%p208_p7, %s554_s15), 1 }
  0x29   : > { %419 = vmatpush1.msk.msra.mxu0 %vm231_vm0, %v218_v2  ;;  %s424_s23 = sshll.u32 %s708_s15, 3 }
  0x2a   : > { %420 = vmatmul.mubr.msk.f32.vlgmr.msra.gmra.mxu0 %vm227_vm1, %v217_v5  ;;  %s215_s30 = scalar_lea.vmem %s696_s3, %s424_s23 }
  0xa2   : > { %v223_v6 = vpop.permute.xlu0 %222 }
  0xea   : > { %v302_v7 = vpop.f32.mrf.mxu0 }
  0xeb   : > { %v303_v9 = vadd.f32 %v302_v7, %v223_v6 }
  0xec   : > { %v304_v8 = vpop.f32.mrf.mxu0 }
  0xed   : > { %v305_v10 = vadd.f32 %v304_v8, %v223_v6 }
  0xef   : > { %v309_v11 = vcombine.low %v303_v9, %v305_v10 }
  0xf1   : > { %311 = vst [vmem:[%s215_s30] sm:$0x77] %v309_v11 }
  0xf2 PF: > { %s16_s17 = sadd.s32 1, %s562_s17   ;;  %s700_s12 = smov %s546_s13 }
  0xf3   : > { %p13_p8 = scmp.ge.s32.totalorder %s16_s17, 4   ;;  %s701_s13 = smov %s550_s14 }
  0xf4   : > { %s702_s14 = smov %s636_s24  ;;  %s703_s15 = smov %s558_s16 }
  0xf5   : > { %s704_s16 = smov %s706_s19  ;;  %15 = sbr.rel (!%p13_p8) target bundleno = 4 (0x4), region = 72 }
  0xfa   :  { %342 = vsyncpa [#allocation3], 1 }
  0xfb   :  { %344 = vsyncpa [#allocation3 + $0x1], 1 }

</bundles_post_ra>
